<compile_context>
chip_gen: v6e
topology: v6e:2x2x1
jax: 0.10.0
libtpu: 0.0.40
codegen_flags: <defaults>
</compile_context>

<pallas_src>
import functools

import jax
import jax.numpy as jnp
from jax.experimental import pallas as pl
from jax.experimental.pallas import tpu as pltpu


# -----------------------------------------------------------------------------
# Fused kernel.  Layout: "phase-major, batch-folded-into-lanes":
#   * output position t = stride*m' + p lives in row block [p*C_out,(p+1)*C_out),
#   * lane column n*W + i holds batch n, buffer position m' = i - 1
#     (i = 0 and i = M+1 are the second conv's zero-padding halo columns).
# Stage 1: one matmul (both transposed-conv taps + rank-2 masked bias folded
# into the contraction).  Stage 2: one matmul (tap/phase selection baked into a
# block-structured LHS; RHS = sublane stack of the 3 column shifts of up||skip).
# -----------------------------------------------------------------------------
def _upsampling_fused_kernel(x2_ref, skip_ref, w1_ref, w2_ref, b2_ref, o_ref, *, C):
    # ---- stage 1: ConvTranspose1d == ONE MXU matmul (bias & masking folded) --
    up = jnp.dot(w1_ref[...], x2_ref[...], preferred_element_type=jnp.float32)
    up = jnp.maximum(up, 0.0).astype(skip_ref.dtype)        # (stride*C_out, N*W)

    # ---- stage 2: "same" Conv1d over concat(up, skip) == ONE MXU matmul -----
    skip = skip_ref[...]                                     # (stride*C_out, N*W)
    rhs = jnp.concatenate(
        [up[:, 0:C],     skip[:, 0:C],                       # shift s = 0
         up[:, 1:1 + C], skip[:, 1:1 + C],                   # shift s = 1
         up[:, 2:2 + C], skip[:, 2:2 + C]],                  # shift s = 2
        axis=0)                                              # (6*stride*C_out, C)
    z = jnp.dot(w2_ref[...], rhs, preferred_element_type=jnp.float32)
    o_ref[...] = jnp.maximum(z + b2_ref[...], 0.0).astype(o_ref.dtype)


# -----------------------------------------------------------------------------
# Wrapper: weight/bias assembly + phase/batch layout plumbing + pallas_call.
# -----------------------------------------------------------------------------
def upsampling_forward(x, skip, w_up, b_up, w_conv, b_conv, *,
                       stride=4, pad_up=0, pad_conv=3,
                       compute_dtype=jnp.bfloat16):
    """x: (N, C_in, L); skip: (N, C_out, L_up).
    w_up: (C_in, C_out, K)       [PyTorch ConvTranspose1d layout]
    w_conv: (C_out, 2*C_out, K)  [PyTorch Conv1d layout]."""
    N, C_in, L = x.shape
    ci_w, C_out, K = w_up.shape
    assert ci_w == C_in
    co2, ci2, k2 = w_conv.shape
    assert co2 == C_out and ci2 == 2 * C_out and k2 == K
    assert pad_up == 0, "only padding_up=0 is supported"
    assert pad_conv == (K - 1) // 2, "only 'same' second conv is supported"
    assert 0 < K - stride <= stride, "kernel assumes ceil(K/stride) == 2"
    assert pad_conv <= stride and (K - 1 - pad_conv) <= stride

    L_up = (L - 1) * stride - 2 * pad_up + K
    assert skip.shape == (N, C_out, L_up)
    M = L + 1                         # phase-space length
    W = M + 2                         # + one halo column per side
    G = stride * C_out                # phase-major row count
    NW = N * W
    C = NW - 2                        # stage-2 output columns (last batch exact)
    rem = (L_up - 1) % stride         # phases <= rem own the extra tail position
    f32 = jnp.float32

    # ---------------- activation layout plumbing (wrapper-side XLA) ----------
    x_pad = jnp.pad(x.astype(f32), ((0, 0), (0, 0), (2, 2)))        # (N,C_in,L+4)
    xa = x_pad[:, :, 1:W + 1]                                       # x[:, m']
    xb = x_pad[:, :, 0:W]                                           # x[:, m'-1]
    col = jnp.arange(W)
    u = ((col >= 1) & (col <= M - 1)).astype(f32)                   # bias for all phases
    v = (col == M).astype(f32)                                      # bias only for p<=rem
    uv = jnp.broadcast_to(jnp.stack([u, v], axis=0), (N, 2, W))
    x2 = jnp.concatenate([xa, xb, uv], axis=1)                      # (N, 2*C_in+2, W)
    kdim = 2 * C_in + 2
    kpad = (-kdim) % 8                                              # align contraction
    if kpad:
        x2 = jnp.pad(x2, ((0, 0), (0, kpad), (0, 0)))
    x2 = x2.transpose(1, 0, 2).reshape(kdim + kpad, NW)             # batch -> lanes

    skip_pad = jnp.pad(skip.astype(f32),
                       ((0, 0), (0, 0), (0, stride * M - L_up)))
    skip_ph = (skip_pad.reshape(N, C_out, M, stride)
               .transpose(0, 3, 1, 2).reshape(N, G, M))             # phase-major
    skip_ph = jnp.pad(skip_ph, ((0, 0), (0, 0), (1, 1)))            # halo columns
    skip_ph = skip_ph.transpose(1, 0, 2).reshape(G, NW)             # batch -> lanes

    # ---------------- weight / bias assembly (trace-time) --------------------
    w_t = jnp.transpose(w_up.astype(f32), (2, 1, 0))                # (K, C_out, C_in)
    w1a = w_t[:stride].reshape(G, C_in)                             # taps k = p
    w1b = jnp.concatenate(
        [w_t[stride:].reshape((K - stride) * C_out, C_in),
         jnp.zeros(((2 * stride - K) * C_out, C_in), f32)], axis=0)  # taps k = p+stride
    b_full = jnp.tile(b_up.astype(f32), stride)[:, None]            # (G, 1)
    b_tail = jnp.concatenate(
        [jnp.tile(b_up.astype(f32), rem + 1),
         jnp.zeros(((stride - 1 - rem) * C_out,), f32)])[:, None]   # (G, 1)
    w1 = jnp.concatenate(
        [w1a, w1b, b_full, b_tail] + ([jnp.zeros((G, kpad), f32)] if kpad else []),
        axis=1)                                                     # (G, kdim+kpad)

    # Stage-2 LHS: block-structured (G, 6*G); rhs row blocks are
    # [up_s0, skip_s0, up_s1, skip_s1, up_s2, skip_s2], phase-major inside.
    wc = w_conv.astype(f32)
    w2 = jnp.zeros((G, 6 * G), f32)
    for p in range(stride):                 # output phase
        for j in range(K):                  # conv tap
            e = p + j - pad_conv
            r, s = e % stride, e // stride + 1          # source phase / shift
            assert 0 <= s <= 2
            row = p * C_out
            cu = (2 * s) * G + r * C_out                # up-channel block
            cs = (2 * s + 1) * G + r * C_out            # skip-channel block
            w2 = w2.at[row:row + C_out, cu:cu + C_out].set(wc[:, :C_out, j])
            w2 = w2.at[row:row + C_out, cs:cs + C_out].set(wc[:, C_out:, j])
    b2 = jnp.tile(b_conv.astype(f32), stride)[:, None]              # (G, 1)

    kernel = functools.partial(_upsampling_fused_kernel, C=C)
    vmem = pl.BlockSpec(memory_space=pltpu.MemorySpace.VMEM)

    out_full = pl.pallas_call(
        kernel,
        out_shape=jax.ShapeDtypeStruct((G, C), x.dtype),
        in_specs=[vmem] * 5,
        out_specs=vmem,
    )(x2.astype(compute_dtype), skip_ph.astype(compute_dtype),
      w1.astype(compute_dtype), w2.astype(compute_dtype), b2)

    # ------------- phase-major, batch-folded -> (N, C_out, L_up) -------------
    out_pad = jnp.pad(out_full, ((0, 0), (0, NW - C)))              # (G, N*W)
    out_ph = out_pad.reshape(G, N, W).transpose(1, 0, 2)[:, :, :M]  # (N, G, M)
    out = (out_ph.reshape(N, stride, C_out, M)
           .transpose(0, 2, 3, 1)
           .reshape(N, C_out, stride * M)[:, :, :L_up])
    return out


# -----------------------------------------------------------------------------
# Module with deterministic synthetic parameters (PyTorch-style layouts)
# -----------------------------------------------------------------------------
class UpSamplingPallas:
    def __init__(self, in_channels, out_channels, kernel_size=7, stride=4,
                 padding_up=0, padding_conv=3, *, key):
        k1, k2, k3, k4 = jax.random.split(key, 4)
        b_up = 1.0 / (out_channels * kernel_size) ** 0.5
        b_cv = 1.0 / (2 * out_channels * kernel_size) ** 0.5
        # ConvTranspose1d weight layout: (in_channels, out_channels, K)
        self.w_up = jax.random.uniform(
            k1, (in_channels, out_channels, kernel_size), jnp.float32, -b_up, b_up)
        self.b_up = jax.random.uniform(
            k2, (out_channels,), jnp.float32, -b_up, b_up)
        # Conv1d weight layout: (out_channels, 2*out_channels, K)
        self.w_conv = jax.random.uniform(
            k3, (out_channels, 2 * out_channels, kernel_size), jnp.float32, -b_cv, b_cv)
        self.b_conv = jax.random.uniform(
            k4, (out_channels,), jnp.float32, -b_cv, b_cv)
        self.stride = stride
        self.padding_up = padding_up
        self.padding_conv = padding_conv

    def __call__(self, x, skip_x):
        return upsampling_forward(x, skip_x, self.w_up, self.b_up,
                                  self.w_conv, self.b_conv,
                                  stride=self.stride, pad_up=self.padding_up,
                                  pad_conv=self.padding_conv)


def reference_forward(x, skip, mod):
    """Pure-JAX reference (lax convs) matching the PyTorch module semantics."""
    K = mod.w_up.shape[2]
    hi = jax.lax.Precision.HIGHEST
    # ConvTranspose1d == conv on dilated input with flipped, transposed kernel.
    w_flip = jnp.flip(jnp.transpose(mod.w_up, (1, 0, 2)), axis=2)   # (C_out,C_in,K)
    y = jax.lax.conv_general_dilated(
        x, w_flip, window_strides=(1,),
        padding=[(K - 1 - mod.padding_up, K - 1 - mod.padding_up)],
        lhs_dilation=(mod.stride,),
        dimension_numbers=("NCH", "OIH", "NCH"), precision=hi)
    y = jax.nn.relu(y + mod.b_up[None, :, None])
    cat = jnp.concatenate([y, skip], axis=1)
    z = jax.lax.conv_general_dilated(
        cat, mod.w_conv, window_strides=(1,),
        padding=[(mod.padding_conv, mod.padding_conv)],
        dimension_numbers=("NCH", "OIH", "NCH"), precision=hi)
    return jax.nn.relu(z + mod.b_conv[None, :, None])


if __name__ == "__main__":
    key = jax.random.PRNGKey(0)
    kx, ks, kp = jax.random.split(key, 3)

    N, C_in, C_out, L = 2, 4, 8, 16
    stride, K, pad_up, pad_conv = 4, 7, 0, 3
    L_up = (L - 1) * stride - 2 * pad_up + K          # 67

    x = jax.random.normal(kx, (N, C_in, L), jnp.float32)
    skip_x = jax.random.normal(ks, (N, C_out, L_up), jnp.float32)

    mod = UpSamplingPallas(C_in, C_out, kernel_size=K, stride=stride,
                           padding_up=pad_up, padding_conv=pad_conv, key=kp)

    out = jax.jit(mod.__call__)(x, skip_x)
    out = jax.block_until_ready(out)

    ref = reference_forward(x, skip_x, mod)
    assert out.shape == ref.shape == (N, C_out, L_up), (out.shape, ref.shape)
    # bf16 MXU inputs with f32 accumulation vs. an f32 HIGHEST-precision
    # reference: widen the tolerance (structural bugs would be O(0.1-1)).
    err = float(jnp.max(jnp.abs(out - ref)))
    assert jnp.allclose(out, ref, atol=3e-2, rtol=3e-2), f"mismatch, max err={err}"

    print("KERNEL_OK")
</pallas_src>

<mosaic_0001>
module attributes {stable_mosaic.version = 11 : i64} {
  func.func @_upsampling_fused_kernel(%arg0: memref<16x38xbf16, #tpu.memory_space<vmem>>, %arg1: memref<32x38xbf16, #tpu.memory_space<vmem>>, %arg2: memref<32x16xbf16, #tpu.memory_space<vmem>>, %arg3: memref<32x192xbf16, #tpu.memory_space<vmem>>, %arg4: memref<32x1xf32, #tpu.memory_space<vmem>>, %arg5: memref<32x36xf32, #tpu.memory_space<vmem>>) attributes {dimension_semantics = [], scalar_prefetch = 0 : i64, scratch_operands = 0 : i64, tpu.core_type = #tpu.core_type<tc>} {
    %c0 = arith.constant 0 : index
    %c0_0 = arith.constant 0 : index
    %0 = vector.load %arg2[%c0, %c0_0] : memref<32x16xbf16, #tpu.memory_space<vmem>>, vector<32x16xbf16>
    %c0_1 = arith.constant 0 : index
    %c0_2 = arith.constant 0 : index
    %1 = vector.load %arg0[%c0_1, %c0_2] : memref<16x38xbf16, #tpu.memory_space<vmem>>, vector<16x38xbf16>
    %cst = arith.constant dense<0.000000e+00> : vector<32x38xf32>
    %2 = tpu.matmul %0, %1, %cst {dimension_numbers = #tpu.dot_dimension_numbers<[1], [0], [0], [1], [0, 0, 1, 1], [], []>} : vector<32x16xbf16>, vector<16x38xbf16>, vector<32x38xf32> -> vector<32x38xf32>
    %cst_3 = arith.constant 0.000000e+00 : f32
    %3 = vector.broadcast %cst_3 : f32 to vector<32x38xf32>
    %4 = arith.maximumf %2, %3 : vector<32x38xf32>
    %5 = arith.truncf %4 : vector<32x38xf32> to vector<32x38xbf16>
    %c0_4 = arith.constant 0 : index
    %c0_5 = arith.constant 0 : index
    %6 = vector.load %arg1[%c0_4, %c0_5] : memref<32x38xbf16, #tpu.memory_space<vmem>>, vector<32x38xbf16>
    %7 = vector.extract_strided_slice %5 {offsets = [0, 0], sizes = [32, 36], strides = [1, 1]} : vector<32x38xbf16> to vector<32x36xbf16>
    %8 = vector.extract_strided_slice %6 {offsets = [0, 0], sizes = [32, 36], strides = [1, 1]} : vector<32x38xbf16> to vector<32x36xbf16>
    %9 = vector.extract_strided_slice %5 {offsets = [0, 1], sizes = [32, 36], strides = [1, 1]} : vector<32x38xbf16> to vector<32x36xbf16>
    %10 = vector.extract_strided_slice %6 {offsets = [0, 1], sizes = [32, 36], strides = [1, 1]} : vector<32x38xbf16> to vector<32x36xbf16>
    %11 = vector.extract_strided_slice %5 {offsets = [0, 2], sizes = [32, 36], strides = [1, 1]} : vector<32x38xbf16> to vector<32x36xbf16>
    %12 = vector.extract_strided_slice %6 {offsets = [0, 2], sizes = [32, 36], strides = [1, 1]} : vector<32x38xbf16> to vector<32x36xbf16>
    %13 = tpu.concatenate %7, %8, %9, %10, %11, %12 in 0 : vector<32x36xbf16>, vector<32x36xbf16>, vector<32x36xbf16>, vector<32x36xbf16>, vector<32x36xbf16>, vector<32x36xbf16> -> vector<192x36xbf16>
    %c0_6 = arith.constant 0 : index
    %c0_7 = arith.constant 0 : index
    %14 = vector.load %arg3[%c0_6, %c0_7] : memref<32x192xbf16, #tpu.memory_space<vmem>>, vector<32x192xbf16>
    %cst_8 = arith.constant dense<0.000000e+00> : vector<32x36xf32>
    %15 = tpu.matmul %14, %13, %cst_8 {dimension_numbers = #tpu.dot_dimension_numbers<[1], [0], [0], [1], [0, 0, 1, 1], [], []>} : vector<32x192xbf16>, vector<192x36xbf16>, vector<32x36xf32> -> vector<32x36xf32>
    %c0_9 = arith.constant 0 : index
    %c0_10 = arith.constant 0 : index
    %16 = vector.load %arg4[%c0_9, %c0_10] : memref<32x1xf32, #tpu.memory_space<vmem>>, vector<32x1xf32>
    %17 = vector.broadcast %16 : vector<32x1xf32> to vector<32x36xf32>
    %18 = arith.addf %15, %17 : vector<32x36xf32>
    %cst_11 = arith.constant 0.000000e+00 : f32
    %19 = vector.broadcast %cst_11 : f32 to vector<32x36xf32>
    %20 = arith.maximumf %18, %19 : vector<32x36xf32>
    %c0_12 = arith.constant 0 : index
    %c0_13 = arith.constant 0 : index
    %21 = vector.load %arg5[%c0_12, %c0_13] : memref<32x36xf32, #tpu.memory_space<vmem>>, vector<32x36xf32>
    tpu.vector_store %arg5[%c0_12, %c0_13], %20 {strides = array<i32>} : memref<32x36xf32, #tpu.memory_space<vmem>>, vector<32x36xf32>,
    return
  }
}

</mosaic_0001>

<bundles_post_ra>
// kernel: tile.0
= control target key start
LH: loop header
LB: loop body
LE: loop exit
PB: predicated region body
PF: predicated region fallthrough
CT: control target
= control target key end

     0   :  { %vm20_vm0 = vcmask 64512   ;;  %s48_s8 = smov 8   ;;  %vm26_vm1 = vcmask 195712   ;;  %vm32_vm2 = vcmask 130112   ;;  %v49_v8 = vmov 0.0   ;;  %s66_s0 = inlined_call_operand.vmem [shape: bf16[3,8], index: 0, kind: input, shape index: {}]   ;;  %s67_s1 = inlined_call_operand.vmem [shape: bf16[24], index: 1, kind: output, shape index: {}]  }
   0x1   :  { %v15_v0 = vld [vmem:[%s66_s0] sm:$0x3]  ;;  %s47_s0 = smov 16  }
   0x2   :  { %v16_v1 = vunpack.c.l.bf16 %v15_v0 }
   0x4   :  { %18 = vst [vmem:[#allocation1] sm:$0xf] %v16_v1 }
   0xb   :  { %v23_v2 = vld [vmem:[#allocation1 + $0x2] sm:$0x1]   ;;  %v19_v3 = vld [vmem:[#allocation1] sm:$0x1]   ;;  %v29_v4 = vld [vmem:[#allocation1 + $0x1] sm:$0x1]  }
   0xc   :  { %24 = vrot.lane.b32.xlu0 %v23_v2, %s47_s0  ;;  %21 = vst.msk [vmem:[#allocation0] sm:$0x1] %vm20_vm0, %v19_v3  }
  0x10   :  { %30 = vrot.lane.b32.xlu0 %v29_v4, %s48_s8 }
  0x7e   :  { %v25_v5 = vpop.permute.xlu0 %24  }
  0x7f   :  { %27 = vst.msk [vmem:[#allocation0] sm:$0x1] %vm26_vm1, %v25_v5  }
  0x82   :  { %v31_v6 = vpop.permute.xlu0 %30  }
  0x83   :  { %33 = vst.msk [vmem:[#allocation0] sm:$0x1] %vm32_vm2, %v31_v6  }
  0x8a   :  { %v39_v7 = vld [vmem:[#allocation0] sm:$0x3] }
  0x8b   :  { %v40_v9 = vpack.c.bf16 %v49_v8, %v39_v7 }
  0x8d   :  { %43 = vst [vmem:[%s67_s1] sm:$0x1] %v40_v9 }

// kernel: tile.2
= control target key start
LH: loop header
LB: loop body
LE: loop exit
PB: predicated region body
PF: predicated region fallthrough
CT: control target
= control target key end

     0   :  { %s121_s8 = smov 125   ;;  %vm20_vm0 = vcmask 7168   ;;  %s122_s9 = smov 126   ;;  %s154_s0 = inlined_call_operand.vmem [shape: bf16[4,8], index: 0, kind: input, shape index: {}]   ;;  %s155_s1 = inlined_call_operand.vmem [shape: bf16[32,1], index: 1, kind: output, shape index: {}]  }
   0x1   :  { %v15_v0 = vld [vmem:[%s154_s0] sm:$0x3]  ;;  %s120_s0 = smov 127   ;;  %s123_s10 = smov 124  }
   0x2   :  { %v16_v1 = vunpack.c.l.bf16 %v15_v0  ;;  %s124_s11 = smov 123   ;;  %s125_s12 = smov 122  }
   0x3   :  { %s126_s13 = smov 121  }
   0x4   :  { %18 = vst [vmem:[#allocation1] sm:$0xf] %v16_v1 }
   0xb   :  { %v22_v2 = vld [vmem:[#allocation1] sm:$0xf]  }
   0xc   :  { %v34_v3 = vld [vmem:[#allocation1] sm:$0xf]   ;;  %23 = vrot.lane.b32.xlu0 %v22_v2, %s120_s0 }
   0xd   :  { %35 = vrot.lane.b32.xlu1 %v34_v3, %s121_s8  ;;  %v28_v4 = vld [vmem:[#allocation1] sm:$0xf]  }
   0xe   :  { %v40_v5 = vld [vmem:[#allocation1] sm:$0xf]  }
   0xf   :  { %v19_v6 = vld [vmem:[#allocation1] sm:$0xf]  }
  0x10   :  { %21 = vst.msk [vmem:[#allocation0] ss:$8 sm:$0xf] %vm20_vm0, %v19_v6   ;;  %29 = vrot.lane.b32.xlu0 %v28_v4, %s122_s9  ;;  %v46_v7 = vld [vmem:[#allocation1] sm:$0xf]  }
  0x11   :  { %41 = vrot.lane.b32.xlu1 %v40_v5, %s123_s10  ;;  %v52_v8 = vld [vmem:[#allocation1] sm:$0xf]  }
  0x12   :  { %v58_v9 = vld [vmem:[#allocation1] sm:$0xf]  }
  0x14   :  { %47 = vrot.lane.b32.xlu0 %v46_v7, %s124_s11 }
  0x15   :  { %53 = vrot.lane.b32.xlu1 %v52_v8, %s125_s12 }
  0x18   :  { %59 = vrot.lane.b32.xlu0 %v58_v9, %s126_s13 }
  0x7e   :  { %v24_v10 = vpop.permute.xlu0 %23  }
  0x7f   :  { %v36_v11 = vpop.permute.xlu1 %35   ;;  %27 = vst.msk [vmem:[#allocation0 + $0x1] ss:$8 sm:$0xf] %vm20_vm0, %v24_v10  }
  0x80   :  { %39 = vst.msk [vmem:[#allocation0 + $0x3] ss:$8 sm:$0xf] %vm20_vm0, %v36_v11  }
  0x82   :  { %v30_v12 = vpop.permute.xlu0 %29  }
  0x83   :  { %v42_v13 = vpop.permute.xlu1 %41   ;;  %33 = vst.msk [vmem:[#allocation0 + $0x2] ss:$8 sm:$0xf] %vm20_vm0, %v30_v12  }
  0x84   :  { %45 = vst.msk [vmem:[#allocation0 + $0x4] ss:$8 sm:$0xf] %vm20_vm0, %v42_v13  }
  0x86   :  { %v48_v14 = vpop.permute.xlu0 %47  }
  0x87   :  { %v54_v15 = vpop.permute.xlu1 %53   ;;  %51 = vst.msk [vmem:[#allocation0 + $0x5] ss:$8 sm:$0xf] %vm20_vm0, %v48_v14  }
  0x88   :  { %57 = vst.msk [vmem:[#allocation0 + $0x6] ss:$8 sm:$0xf] %vm20_vm0, %v54_v15  }
  0x8a   :  { %v60_v16 = vpop.permute.xlu0 %59  }
  0x8b   :  { %63 = vst.msk [vmem:[#allocation0 + $0x7] ss:$8 sm:$0xf] %vm20_vm0, %v60_v16  }
  0x92   :  { %v69_v17 = vld [vmem:[#allocation0] sm:$0xff]  ;;  %v75_v18 = vld [vmem:[#allocation0 + $0x8] sm:$0xff]  ;;  %v82_v19 = vld [vmem:[#allocation0 + $0x10] sm:$0xff] }
  0x93   :  { %v105_v20 = vpack.c.bf16 %v75_v18, %v69_v17  ;;  %v90_v21 = vld [vmem:[#allocation0 + $0x18] sm:$0xff] }
  0x94   :  { %v110_v22 = vpack.c.bf16 %v90_v21, %v82_v19 }
  0x95   :  { %106 = vst [vmem:[%s155_s1] sm:$0xff] %v105_v20  }
  0x96   :  { %112 = vst [vmem:[%s155_s1 + $0x8] sm:$0xff] %v110_v22  }

// kernel: tile.22
= control target key start
LH: loop header
LB: loop body
LE: loop exit
PB: predicated region body
PF: predicated region fallthrough
CT: control target
= control target key end

     0   :  { %s22_s0 = inlined_call_operand.vmem [shape: f32[8], index: 0, kind: input, shape index: {}]   ;;  %s23_s1 = inlined_call_operand.vmem [shape: f32[4,8], index: 1, kind: output, shape index: {}]  }
   0x1   :  { %v4_v0 = vld [vmem:[%s22_s0] ss:$0 sm:$0xff] }
   0x2   :  { %5 = vst [vmem:[%s23_s1] sm:$0xf] %v4_v0 }

// kernel: tile.3
= control target key start
LH: loop header
LB: loop body
LE: loop exit
PB: predicated region body
PF: predicated region fallthrough
CT: control target
= control target key end

     0   :  { %s67_s8 = smov 125   ;;  %vm8_vm0 = vcmask 7168   ;;  %s68_s11 = smov 126   ;;  %s118_s0 = inlined_call_operand.vmem [shape: f32[4,8], index: 0, kind: input, shape index: {}]   ;;  %s119_s1 = inlined_call_operand.vmem [shape: f32[32,1], index: 1, kind: output, shape index: {}]  }
   0x1   :  { %v5_v0 = vld [vmem:[%s118_s0] sm:$0xf]  ;;  %s66_s0 = smov 127   ;;  %s69_s12 = smov 124  }
   0x2   :  { %6 = vst [vmem:[#allocation0] sm:$0xf] %v5_v0  ;;  %s70_s13 = smov 123   ;;  %s71_s14 = smov 122  }
   0x3   :  { %s72_s15 = smov 121  }
   0x9   :  { %v10_v1 = vld [vmem:[#allocation0] sm:$0xf]  }
   0xa   :  { %v22_v2 = vld [vmem:[#allocation0] sm:$0xf]   ;;  %11 = vrot.lane.b32.xlu0 %v10_v1, %s66_s0 }
   0xb   :  { %23 = vrot.lane.b32.xlu1 %v22_v2, %s67_s8  ;;  %v16_v3 = vld [vmem:[#allocation0] sm:$0xf]  }
   0xc   :  { %v28_v4 = vld [vmem:[#allocation0] sm:$0xf]  }
   0xd   :  { %v7_v5 = vld [vmem:[#allocation0] sm:$0xf]  }
   0xe   :  { %9 = vst.msk [vmem:[%s119_s1] ss:$8 sm:$0xf] %vm8_vm0, %v7_v5   ;;  %17 = vrot.lane.b32.xlu0 %v16_v3, %s68_s11  ;;  %v34_v6 = vld [vmem:[#allocation0] sm:$0xf]  }
   0xf   :  { %29 = vrot.lane.b32.xlu1 %v28_v4, %s69_s12  ;;  %v40_v7 = vld [vmem:[#allocation0] sm:$0xf]  }
  0x10   :  { %v46_v8 = vld [vmem:[#allocation0] sm:$0xf]  }
  0x12   :  { %35 = vrot.lane.b32.xlu0 %v34_v6, %s70_s13 }
  0x13   :  { %41 = vrot.lane.b32.xlu1 %v40_v7, %s71_s14 }
  0x16   :  { %47 = vrot.lane.b32.xlu0 %v46_v8, %s72_s15 }
  0x7c   :  { %v12_v9 = vpop.permute.xlu0 %11  }
  0x7d   :  { %v24_v10 = vpop.permute.xlu1 %23   ;;  %52 = vst.msk [vmem:[%s119_s1 + $0x1] ss:$8 sm:$0xf] %vm8_vm0, %v12_v9  }
  0x7e   :  { %54 = vst.msk [vmem:[%s119_s1 + $0x3] ss:$8 sm:$0xf] %vm8_vm0, %v24_v10  }
  0x80   :  { %v18_v11 = vpop.permute.xlu0 %17  }
  0x81   :  { %v30_v12 = vpop.permute.xlu1 %29   ;;  %53 = vst.msk [vmem:[%s119_s1 + $0x2] ss:$8 sm:$0xf] %vm8_vm0, %v18_v11  }
  0x82   :  { %55 = vst.msk [vmem:[%s119_s1 + $0x4] ss:$8 sm:$0xf] %vm8_vm0, %v30_v12  }
  0x84   :  { %v36_v13 = vpop.permute.xlu0 %35  }
  0x85   :  { %v42_v14 = vpop.permute.xlu1 %41   ;;  %56 = vst.msk [vmem:[%s119_s1 + $0x5] ss:$8 sm:$0xf] %vm8_vm0, %v36_v13  }
  0x86   :  { %57 = vst.msk [vmem:[%s119_s1 + $0x6] ss:$8 sm:$0xf] %vm8_vm0, %v42_v14  }
  0x88   :  { %v48_v15 = vpop.permute.xlu0 %47  }
  0x89   :  { %58 = vst.msk [vmem:[%s119_s1 + $0x7] ss:$8 sm:$0xf] %vm8_vm0, %v48_v15  }

// kernel: a_call__.1
= control target key start
LH: loop header
LB: loop body
LE: loop exit
PB: predicated region body
PF: predicated region fallthrough
CT: control target
= control target key end

     0   :  { %vm43_vm0 = vcmask 130048   ;;  %s324_s26 = smov 127   ;;  %v326_v5 = vmov 0   ;;  %vm193_vm1 = vcmask 523264   ;;  %vm253_vm2 = vcmask 293888   ;;  %s458_s0 = inlined_call_operand.vmem [shape: bf16[16,38], index: 0, kind: input, shape index: {}]   ;;  %s459_s2 = inlined_call_operand.vmem [shape: bf16[32,16], index: 2, kind: input, shape index: {}]   ;;  %s460_s1 = inlined_call_operand.vmem [shape: bf16[32,38], index: 1, kind: input, shape index: {}]   ;;  %s461_s3 = inlined_call_operand.vmem [shape: bf16[32,192], index: 3, kind: input, shape index: {}]   ;;  %s462_s4 = inlined_call_operand.vmem [shape: f32[32,1], index: 4, kind: input, shape index: {}]   ;;  %s463_s5 = inlined_call_operand.vmem [shape: f32[32,36], index: 5, kind: output, shape index: {}]  }
   0x1   :  { %v313_v0 = vld [vmem:[%s458_s0] sm:$0xff]   ;;  %v315_v2 = vld [vmem:[%s459_s2 + $0x8] sm:$0xff]   ;;  %284 = vmatprep.subr.bf16.mxu1 %v326_v5  ;;  %312 = vset.pattern.permute.xlu1 %v326_v5  ;;  %v322_v19 = vld [vmem:[%s461_s3 + $0x14] ss:$8 sps:$4 sm:$0xff]  }
   0x2   :  { %v314_v1 = vld [vmem:[%s459_s2] sm:$0xff]   ;;  %278 = vmatprep.subr.bf16.mxu0 %v313_v0  ;;  %v369_v3 = vld [vmem:[%s460_s1 + $0x8] sm:$0xff]   ;;  %s325_s2 = smov 126   ;;  %311 = vset.pattern.permute.xlu0 %v326_v5  ;;  %v154_v22 = vld [vmem:[%s462_s4 + $0x18] sm:$0xff] }
   0x3   :  { %279 = vmatpush3.bf16.msra.mxu0 %v313_v0  ;;  %280 = vmatprep.mubr.msk.bf16.mxu0 %vm43_vm0, %v314_v1  ;;  %v376_v4 = vld [vmem:[%s460_s1] sm:$0xff]   ;;  %v152_v21 = vld [vmem:[%s462_s4 + $0x8] sm:$0xff]  ;;  %v153_v23 = vld [vmem:[%s462_s4 + $0x10] sm:$0xff] }
   0x4   :  { %131 = vrot.lane.b32.xlu0 %v369_v3, %s324_s26  ;;  %200 = vmatprep.subr.bf16.mxu0 %v326_v5  ;;  %v318_v18 = vld [vmem:[%s461_s3 + $0x4] ss:$8 sps:$4 sm:$0xff]   ;;  %v320_v30 = vld [vmem:[%s461_s3 + $0x10] ss:$8 sps:$4 sm:$0xff]   ;;  %v323_v31 = vld [vmem:[%s461_s3] ss:$8 sps:$4 sm:$0xff]  }
   0x5   :  { %274 = vmatprep.mubr.msk.bf16.mxu1 %vm193_vm1, %v322_v19  ;;  %v151_v20 = vld [vmem:[%s462_s4] sm:$0xff] }
   0x6   :  { %281 = vmatmul.mubr.msk.bf16.vlgmr.msra.gmra.mxu0 %vm43_vm0, %v315_v2 }
   0x7   :  { %273 = vmatprep.mubr.msk.bf16.mxu0 %vm193_vm1, %v318_v18 }
   0x8   :  { %129 = vrot.lane.b32.xlu0 %v376_v4, %s324_s26 }
   0xc   :  { %143 = vrot.lane.b32.xlu0 %v369_v3, %s325_s2 }
  0x76   :  { %v132_v6 = vpop.permute.xlu0 %131 }
  0x77   :  { %201 = vmatpush1.bf16.msra.mxu0 %v132_v6  ;;  %296 = vmatpush1.bf16.msra.mxu1 %v132_v6 }
  0x78   :  { %285 = vmatprep.subr.bf16.mxu1 %v326_v5  ;;  %202 = vmatprep.subr.bf16.mxu0 %v326_v5 }
  0x7a   :  { %v130_v7 = vpop.permute.xlu0 %129 }
  0x7b   :  { %203 = vmatpush1.bf16.msra.mxu0 %v130_v7  ;;  %297 = vmatpush1.bf16.msra.mxu1 %v130_v7 }
  0x7c   :  { %204 = vmatprep.subr.bf16.mxu0 %v326_v5  ;;  %286 = vmatprep.subr.bf16.mxu1 %v326_v5 }
  0x7e   :  { %v144_v26 = vpop.permute.xlu0 %143 }
  0xc6   :  { %v282_v8 = vpop.f32.mrf.mxu0 }
  0xc7   :  { %v101_v11 = vmax.f32 %v282_v8, 0.0 }
  0xc8   :  { %v84_v9 = vpop.f32.mrf.mxu0 }
  0xc9   :  { %v99_v16 = vmax.f32 %v84_v9, 0.0 }
  0xca   :  { %v283_v10 = vpop.f32.mrf.mxu0 }
  0xcb   :  { %v102_v12 = vmax.f32 %v283_v10, 0.0 }
  0xcc   :  { %v87_v13 = vpop.f32.mrf.mxu0 }
  0xcd   :  { %v104_v14 = vpack.c.bf16 %v102_v12, %v101_v11  ;;  %v100_v15 = vmax.f32 %v87_v13, 0.0 }
  0xcf   :  { %137 = vrot.lane.b32.xlu0 %v104_v14, %s325_s2  ;;  %125 = vrot.lane.b32.xlu1 %v104_v14, %s324_s26  ;;  %v103_v17 = vpack.c.bf16 %v100_v15, %v99_v16 }
  0xd3   :  { %123 = vrot.lane.b32.xlu1 %v103_v17, %s324_s26  ;;  %157 = vperm.xlu0 %311, %v151_v20  }
  0xd7   :  { %141 = vrot.lane.b32.xlu1 %v376_v4, %s325_s2  ;;  %172 = vperm.xlu0 %311, %v154_v22  }
  0xdb   :  { %135 = vrot.lane.b32.xlu1 %v103_v17, %s325_s2 }
  0xdf   :  { %162 = vperm.xlu1 %312, %v152_v21  }
  0xe3   :  { %167 = vperm.xlu1 %312, %v153_v23  }
 0x141   :  { %v126_v24 = vpop.permute.xlu1 %125  ;;  %v138_v28 = vpop.permute.xlu0 %137 }
 0x142   :  { %205 = vmatpush1.bf16.msra.mxu0 %v126_v24  ;;  %298 = vmatpush1.bf16.msra.mxu1 %v126_v24 }
 0x143   :  { %206 = vmatprep.subr.bf16.mxu0 %v326_v5  ;;  %287 = vmatprep.subr.bf16.mxu1 %v326_v5 }
 0x145   :  { %v124_v25 = vpop.permute.xlu1 %123 }
 0x146   :  { %207 = vmatpush1.bf16.msra.mxu0 %v124_v25  ;;  %299 = vmatpush1.bf16.msra.mxu1 %v124_v25 }
 0x147   :  { %208 = vmatprep.subr.bf16.mxu0 %v326_v5  ;;  %288 = vmatprep.subr.bf16.mxu1 %v326_v5 }
 0x149   :  { %v142_v27 = vpop.permute.xlu1 %141 }
 0x14a   :  { %209 = vmatpush1.bf16.msra.mxu0 %v369_v3  ;;  %300 = vmatpush1.bf16.msra.mxu1 %v369_v3 }
 0x14b   :  { %210 = vmatprep.subr.bf16.mxu0 %v326_v5  ;;  %289 = vmatprep.subr.bf16.mxu1 %v326_v5 }
 0x14d   :  { %v136_v29 = vpop.permute.xlu1 %135 }
 0x14e   :  { %211 = vmatpush1.bf16.msra.mxu0 %v376_v4  ;;  %301 = vmatpush1.bf16.msra.mxu1 %v376_v4  ;;  %v158_v33 = vpop.permute.xlu0 %157 }
 0x14f   :  { %212 = vmatprep.subr.bf16.mxu0 %v326_v5  ;;  %290 = vmatprep.subr.bf16.mxu1 %v326_v5 }
 0x152   :  { %213 = vmatpush1.bf16.msra.mxu0 %v104_v14  ;;  %302 = vmatpush1.bf16.msra.mxu1 %v104_v14  ;;  %v173_v41 = vpop.permute.xlu0 %172 }
 0x153   :  { %214 = vmatprep.subr.bf16.mxu0 %v326_v5  ;;  %291 = vmatprep.subr.bf16.mxu1 %v326_v5 }
 0x156   :  { %215 = vmatpush1.bf16.msra.mxu0 %v103_v17  ;;  %303 = vmatpush1.bf16.msra.mxu1 %v103_v17 }
 0x157   :  { %224 = vmatprep.subr.bf16.mxu0 %v326_v5  ;;  %292 = vmatprep.subr.bf16.mxu1 %v326_v5 }
 0x15a   :  { %225 = vmatpush2.bf16.msra.mxu0 %v144_v26  ;;  %304 = vmatpush2.bf16.msra.mxu1 %v144_v26  ;;  %v163_v32 = vpop.permute.xlu1 %162 }
 0x15b   :  { %226 = vmatprep.subr.bf16.mxu0 %v326_v5  ;;  %293 = vmatprep.subr.bf16.mxu1 %v326_v5 }
 0x15e   :  { %227 = vmatpush2.bf16.msra.mxu0 %v142_v27  ;;  %305 = vmatpush2.bf16.msra.mxu1 %v142_v27  ;;  %v168_v34 = vpop.permute.xlu1 %167 }
 0x15f   :  { %228 = vmatprep.subr.bf16.mxu0 %v326_v5  ;;  %294 = vmatprep.subr.bf16.mxu1 %v326_v5 }
 0x162   :  { %229 = vmatpush2.bf16.msra.mxu0 %v138_v28  ;;  %306 = vmatpush2.bf16.msra.mxu1 %v138_v28 }
 0x163   :  { %230 = vmatprep.subr.bf16.mxu0 %v326_v5  ;;  %295 = vmatprep.subr.bf16.mxu1 %v326_v5 }
 0x166   :  { %231 = vmatpush2.bf16.msra.mxu0 %v136_v29  ;;  %307 = vmatpush2.bf16.msra.mxu1 %v136_v29 }
 0x169   :  { %233 = vmatmul.mubr.bf16.vlgmr.msra.gmra.mxu0 %v323_v31  ;;  %241 = vmatmul.mubr.bf16.vlgmr.msra.gmra.mxu1 %v320_v30 }
 0x229   :  { %v234_v35 = vpop.f32.mrf.mxu0  ;;  %v242_v36 = vpop.f32.mrf.mxu1 }
 0x22a   :  { %v235_v37 = vadd.f32 %v234_v35, %v158_v33  ;;  %v243_v38 = vadd.f32 %v242_v36, %v168_v34 }
 0x22b   :  { %v236_v39 = vpop.f32.mrf.mxu0  ;;  %v244_v40 = vpop.f32.mrf.mxu1 }
 0x22c   :  { %v249_v42 = vmax.f32 %v235_v37, 0.0  ;;  %v251_v43 = vmax.f32 %v243_v38, 0.0 }
 0x22d   :  { %v237_v44 = vpop.f32.mrf.mxu0  ;;  %v245_v45 = vpop.f32.mrf.mxu1 }
 0x22e   :  { %254 = vst.msk [vmem:[%s463_s5] sm:$0xff] %vm253_vm2, %v249_v42  ;;  %256 = vst.msk [vmem:[%s463_s5 + $0x10] sm:$0xff] %vm253_vm2, %v251_v43  ;;  %v238_v46 = vadd.f32 %v237_v44, %v163_v32  ;;  %v246_v47 = vadd.f32 %v245_v45, %v173_v41 }
 0x22f   :  { %v239_v48 = vpop.f32.mrf.mxu0  ;;  %v247_v49 = vpop.f32.mrf.mxu1 }
 0x230   :  { %v250_v50 = vmax.f32 %v238_v46, 0.0  ;;  %v252_v51 = vmax.f32 %v246_v47, 0.0 }
 0x232   :  { %255 = vst.msk [vmem:[%s463_s5 + $0x8] sm:$0xff] %vm253_vm2, %v250_v50  ;;  %257 = vst.msk [vmem:[%s463_s5 + $0x18] sm:$0xff] %vm253_vm2, %v252_v51 }

</bundles_post_ra>
